<compile_context>
chip_gen: v6e
topology: v6e:2x2x1
jax: 0.10.0
libtpu: 0.0.40
codegen_flags: <defaults>
</compile_context>

<pallas_src>
import math
import functools

import jax
import jax.numpy as jnp
from jax.experimental import pallas as pl
from jax.experimental.pallas import tpu as pltpu


def _layernorm(x, gamma, beta, eps=1e-12):
    mean = jnp.mean(x, axis=-1, keepdims=True)
    xc = x - mean
    var = jnp.mean(xc * xc, axis=-1, keepdims=True)
    return xc * jax.lax.rsqrt(var + eps) * gamma + beta


def _gelu_exact(x):
    # F.gelu default = exact erf formulation
    return 0.5 * x * (1.0 + jax.lax.erf(x * (1.0 / math.sqrt(2.0))))


def _encoder_layer_kernel(
    x_ref,
    wqkv_ref, bqkv_ref,
    wo_ref, bo_ref,
    w1_ref, b1_ref, w2_ref, b2_ref,
    g1_ref, be1_ref, g2_ref, be2_ref,
    out_ref,
    *, num_heads):
    _, S, D = x_ref.shape
    H = num_heads
    hd = D // H

    xb = x_ref[0]                                     # (S, D) f32 residual copy
    x_bf = xb.astype(jnp.bfloat16)

    # ---- fused QKV projection: one bf16 (S,D)@(D,3D) MXU matmul, f32 accumulate.
    # The 1/sqrt(hd) scale is pre-folded into the q slice of wqkv / bqkv.
    qkv = jnp.dot(x_bf, wqkv_ref[...], preferred_element_type=jnp.float32) + bqkv_ref[...]

    # ---- head-batched attention: (H, S, hd) views, no per-head lane slicing loop.
    def heads(t):
        return t.reshape(S, H, hd).transpose(1, 0, 2)     # (H, S, hd)

    qh = heads(qkv[:, 0 * D:1 * D]).astype(jnp.bfloat16)
    kh = heads(qkv[:, 1 * D:2 * D]).astype(jnp.bfloat16)
    vh = heads(qkv[:, 2 * D:3 * D]).astype(jnp.bfloat16)

    s = jnp.einsum("hqd,hkd->hqk", qh, kh, preferred_element_type=jnp.float32)  # (H,S,S)
    s = s - jnp.max(s, axis=-1, keepdims=True)        # numerically-stable softmax
    p = jnp.exp(s)                                    # unnormalized probs (f32)
    denom = jnp.sum(p, axis=-1, keepdims=True)        # (H, S, 1)
    ctx = jnp.einsum("hqk,hkd->hqd", p.astype(jnp.bfloat16), vh,
                     preferred_element_type=jnp.float32)                        # (H,S,hd)
    # Normalize after P@V: S*hd elements instead of S*S, reciprocal on the EUP.
    ctx = ctx * pl.reciprocal(denom, approx=True)

    ctx = ctx.transpose(1, 0, 2).reshape(S, D)        # heads back onto the lane axis
    attn = jnp.dot(ctx.astype(jnp.bfloat16), wo_ref[...],
                   preferred_element_type=jnp.float32) + bo_ref[...]

    # TODO(synk): dropout / dropout1 / dropout2 are identity (eval / inference mode);
    #             attn_mask / key_padding_mask are None in this path and not implemented.
    h1 = _layernorm(xb + attn, g1_ref[...], be1_ref[...])

    # ---- feed-forward (bf16 MXU operands, f32 accumulate / activations) ----
    ffh = jnp.dot(h1.astype(jnp.bfloat16), w1_ref[...],
                  preferred_element_type=jnp.float32) + b1_ref[...]
    ff = jnp.dot(_gelu_exact(ffh).astype(jnp.bfloat16), w2_ref[...],
                 preferred_element_type=jnp.float32) + b2_ref[...]

    out_ref[0] = _layernorm(h1 + ff, g2_ref[...], be2_ref[...]).astype(out_ref.dtype)


def transformer_encoder_layer(src, params, num_heads):
    """src: (S, B, D) float32 (PyTorch seq-first, batch_first=False). Returns (S, B, D)."""
    S, B, D = src.shape
    F = params["w1"].shape[0]
    hd = D // num_heads
    scale = 1.0 / math.sqrt(hd)

    # TODO(synk): at production sizes avoid this HBM round-trip by blocking the (S, B, D)
    #             array directly / keeping a batch-first layout upstream; negligible here.
    x = jnp.transpose(src, (1, 0, 2))                 # (B, S, D) kernel layout, f32

    # Weight prep (plain-JAX glue): pre-transpose to (in,out), fuse QKV, fold the
    # 1/sqrt(hd) scale into the q slice, cast MXU operands to bf16.
    wqkv = jnp.concatenate(
        [params["wq"].T * scale, params["wk"].T, params["wv"].T], axis=1
    ).astype(jnp.bfloat16)                            # (D, 3D)
    bqkv = jnp.concatenate(
        [params["bq"] * scale, params["bk"], params["bv"]]).reshape(1, 3 * D)   # f32
    wo = params["wo"].T.astype(jnp.bfloat16)          # (D, D)
    w1 = params["w1"].T.astype(jnp.bfloat16)          # (D, F)
    w2 = params["w2"].T.astype(jnp.bfloat16)          # (F, D)

    args = (
        x, wqkv, bqkv,
        wo, params["bo"].reshape(1, D),
        w1, params["b1"].reshape(1, F),
        w2, params["b2"].reshape(1, D),
        params["g1"].reshape(1, D), params["be1"].reshape(1, D),
        params["g2"].reshape(1, D), params["be2"].reshape(1, D),
    )

    def resident_spec(a):
        # Full-array block + constant index_map: fetched once, VMEM-resident across
        # the batch grid.
        return pl.BlockSpec(a.shape, lambda b, _n=a.ndim: (0,) * _n)

    in_specs = [pl.BlockSpec((1, S, D), lambda b: (b, 0, 0))] + \
               [resident_spec(a) for a in args[1:]]

    # Advisory cost estimate (whole layer, all batches) for XLA's scheduler.
    flops = 2 * B * S * (D * 3 * D + 2 * S * D + D * D + 2 * D * F)
    transcendentals = B * (num_heads * S * S + S * F)          # exp + erf (approx.)
    bytes_accessed = 4 * (2 * B * S * D) + 2 * (3 * D * D + 2 * D * F) + 4 * (8 * D + F)
    cost = pl.CostEstimate(flops=flops, transcendentals=transcendentals,
                           bytes_accessed=bytes_accessed)

    out = pl.pallas_call(
        functools.partial(_encoder_layer_kernel, num_heads=num_heads),
        grid=(B,),
        in_specs=in_specs,
        out_specs=pl.BlockSpec((1, S, D), lambda b: (b, 0, 0)),
        out_shape=jax.ShapeDtypeStruct((B, S, D), jnp.float32),
        compiler_params=pltpu.CompilerParams(
            dimension_semantics=("parallel",),        # megacore-shard / pipeline over batch
            vmem_limit_bytes=32 * 1024 * 1024,
        ),
        cost_estimate=cost,
    )(*args)
    return jnp.transpose(out, (1, 0, 2))


# ---------------- pure-JAX reference (mirrors PyTorch eval-mode forward, f32) ----------------
def ref_forward(src, p, num_heads):
    S, B, D = src.shape
    hd = D // num_heads

    def lin(x, w, b):  # PyTorch Linear: y = x @ W^T + b
        return jnp.einsum("sbd,ed->sbe", x, w) + b

    q = lin(src, p["wq"], p["bq"]).reshape(S, B, num_heads, hd).transpose(1, 2, 0, 3)
    k = lin(src, p["wk"], p["bk"]).reshape(S, B, num_heads, hd).transpose(1, 2, 0, 3)
    v = lin(src, p["wv"], p["bv"]).reshape(S, B, num_heads, hd).transpose(1, 2, 0, 3)
    s = jnp.einsum("bhqd,bhkd->bhqk", q, k) / math.sqrt(hd)
    a = jax.nn.softmax(s, axis=-1)
    o = jnp.einsum("bhqk,bhkd->bhqd", a, v).transpose(2, 0, 1, 3).reshape(S, B, D)
    attn_out = lin(o, p["wo"], p["bo"])

    def ln(x, g, b):
        m = x.mean(-1, keepdims=True)
        var = ((x - m) ** 2).mean(-1, keepdims=True)
        return (x - m) / jnp.sqrt(var + 1e-12) * g + b

    x1 = ln(src + attn_out, p["g1"], p["be1"])
    h = jax.nn.gelu(jnp.einsum("sbd,fd->sbf", x1, p["w1"]) + p["b1"], approximate=False)
    ff = jnp.einsum("sbf,df->sbd", h, p["w2"]) + p["b2"]
    return ln(x1 + ff, p["g2"], p["be2"])


def init_params(key, d_model, dim_feedforward):
    D, F = d_model, dim_feedforward
    ks = jax.random.split(key, 16)

    def w(k, shape, scale):
        return jax.random.normal(k, shape, jnp.float32) * scale

    s_d, s_f = 1.0 / math.sqrt(D), 1.0 / math.sqrt(F)
    return dict(
        wq=w(ks[0], (D, D), s_d), wk=w(ks[1], (D, D), s_d), wv=w(ks[2], (D, D), s_d),
        bq=w(ks[3], (D,), 0.02), bk=w(ks[4], (D,), 0.02), bv=w(ks[5], (D,), 0.02),
        wo=w(ks[6], (D, D), s_d), bo=w(ks[7], (D,), 0.02),
        w1=w(ks[8], (F, D), s_d), b1=w(ks[9], (F,), 0.02),
        w2=w(ks[10], (D, F), s_f), b2=w(ks[11], (D,), 0.02),
        g1=jnp.ones((D,), jnp.float32) + w(ks[12], (D,), 0.01),
        be1=w(ks[13], (D,), 0.01),
        g2=jnp.ones((D,), jnp.float32) + w(ks[14], (D,), 0.01),
        be2=w(ks[15], (D,), 0.01),
    )


if __name__ == "__main__":
    S, B, D, H, F = 8, 2, 32, 4, 64   # seq, batch, d_model, heads, dim_feedforward
    key = jax.random.PRNGKey(0)
    k_x, k_p = jax.random.split(key)
    src = jax.random.normal(k_x, (S, B, D), jnp.float32)
    params = init_params(k_p, D, F)

    out = transformer_encoder_layer(src, params, H)
    out = jax.block_until_ready(out)

    ref = ref_forward(src, params, H)
    err = float(jnp.max(jnp.abs(out - ref)))
    assert out.shape == (S, B, D), out.shape
    assert bool(jnp.all(jnp.isfinite(out)))
    # bf16 MXU operands (mirroring the module's @autocast mixed precision) plus the
    # approximate softmax reciprocal widen the gap vs. the pure-f32 reference; the
    # tolerance is sized for that dtype difference, not for any algorithmic change.
    assert err < 6e-2, f"max abs err {err}"
    print("KERNEL_OK")
</pallas_src>

<mosaic_0001>
module attributes {stable_mosaic.version = 11 : i64} {
  func.func @_encoder_layer_kernel(%arg0: i32, %arg1: memref<1x8x32xf32, #tpu.memory_space<vmem>>, %arg2: memref<32x96xbf16, #tpu.memory_space<vmem>>, %arg3: memref<1x96xf32, #tpu.memory_space<vmem>>, %arg4: memref<32x32xbf16, #tpu.memory_space<vmem>>, %arg5: memref<1x32xf32, #tpu.memory_space<vmem>>, %arg6: memref<32x64xbf16, #tpu.memory_space<vmem>>, %arg7: memref<1x64xf32, #tpu.memory_space<vmem>>, %arg8: memref<64x32xbf16, #tpu.memory_space<vmem>>, %arg9: memref<1x32xf32, #tpu.memory_space<vmem>>, %arg10: memref<1x32xf32, #tpu.memory_space<vmem>>, %arg11: memref<1x32xf32, #tpu.memory_space<vmem>>, %arg12: memref<1x32xf32, #tpu.memory_space<vmem>>, %arg13: memref<1x32xf32, #tpu.memory_space<vmem>>, %arg14: memref<1x8x32xf32, #tpu.memory_space<vmem>>) attributes {dimension_semantics = [#tpu.dimension_semantics<parallel>], iteration_bounds = array<i64: 2>, scalar_prefetch = 0 : i64, scratch_operands = 0 : i64, tpu.core_type = #tpu.core_type<tc>, window_params = [{transform_indices = @transform_0, window_bounds = array<i64: 1, 8, 32>}, {pipeline_mode = #tpu.pipeline_mode<synchronous>, transform_indices = @transform_1, window_bounds = array<i64: 32, 96>}, {pipeline_mode = #tpu.pipeline_mode<synchronous>, transform_indices = @transform_2, window_bounds = array<i64: 1, 96>}, {pipeline_mode = #tpu.pipeline_mode<synchronous>, transform_indices = @transform_3, window_bounds = array<i64: 32, 32>}, {pipeline_mode = #tpu.pipeline_mode<synchronous>, transform_indices = @transform_4, window_bounds = array<i64: 1, 32>}, {pipeline_mode = #tpu.pipeline_mode<synchronous>, transform_indices = @transform_5, window_bounds = array<i64: 32, 64>}, {pipeline_mode = #tpu.pipeline_mode<synchronous>, transform_indices = @transform_6, window_bounds = array<i64: 1, 64>}, {pipeline_mode = #tpu.pipeline_mode<synchronous>, transform_indices = @transform_7, window_bounds = array<i64: 64, 32>}, {pipeline_mode = #tpu.pipeline_mode<synchronous>, transform_indices = @transform_8, window_bounds = array<i64: 1, 32>}, {pipeline_mode = #tpu.pipeline_mode<synchronous>, transform_indices = @transform_9, window_bounds = array<i64: 1, 32>}, {pipeline_mode = #tpu.pipeline_mode<synchronous>, transform_indices = @transform_10, window_bounds = array<i64: 1, 32>}, {pipeline_mode = #tpu.pipeline_mode<synchronous>, transform_indices = @transform_11, window_bounds = array<i64: 1, 32>}, {pipeline_mode = #tpu.pipeline_mode<synchronous>, transform_indices = @transform_12, window_bounds = array<i64: 1, 32>}, {transform_indices = @transform_13, window_bounds = array<i64: 1, 8, 32>}]} {
    %c0 = arith.constant 0 : index
    %c0_0 = arith.constant 0 : index
    %c0_1 = arith.constant 0 : index
    %0 = vector.load %arg1[%c0, %c0_0, %c0_1] : memref<1x8x32xf32, #tpu.memory_space<vmem>>, vector<1x8x32xf32>
    %1 = vector.shape_cast %0 : vector<1x8x32xf32> to vector<8x32xf32>
    %2 = arith.truncf %1 : vector<8x32xf32> to vector<8x32xbf16>
    %c0_2 = arith.constant 0 : index
    %c0_3 = arith.constant 0 : index
    %3 = vector.load %arg2[%c0_2, %c0_3] : memref<32x96xbf16, #tpu.memory_space<vmem>>, vector<32x96xbf16>
    %cst = arith.constant dense<0.000000e+00> : vector<8x96xf32>
    %4 = tpu.matmul %2, %3, %cst {dimension_numbers = #tpu.dot_dimension_numbers<[1], [0], [0], [1], [0, 0, 1, 1], [], []>} : vector<8x32xbf16>, vector<32x96xbf16>, vector<8x96xf32> -> vector<8x96xf32>
    %c0_4 = arith.constant 0 : index
    %c0_5 = arith.constant 0 : index
    %5 = vector.load %arg3[%c0_4, %c0_5] : memref<1x96xf32, #tpu.memory_space<vmem>>, vector<1x96xf32>
    %6 = vector.broadcast %5 : vector<1x96xf32> to vector<8x96xf32>
    %7 = arith.addf %4, %6 : vector<8x96xf32>
    %8 = vector.extract_strided_slice %7 {offsets = [0, 0], sizes = [8, 32], strides = [1, 1]} : vector<8x96xf32> to vector<8x32xf32>
    %9 = vector.shape_cast %8 : vector<8x32xf32> to vector<8x4x8xf32>
    %10 = tpu.transpose %9, [1, 0, 2] : vector<8x4x8xf32> -> vector<4x8x8xf32>
    %11 = arith.truncf %10 : vector<4x8x8xf32> to vector<4x8x8xbf16>
    %12 = vector.extract_strided_slice %7 {offsets = [0, 32], sizes = [8, 32], strides = [1, 1]} : vector<8x96xf32> to vector<8x32xf32>
    %13 = vector.shape_cast %12 : vector<8x32xf32> to vector<8x4x8xf32>
    %14 = tpu.transpose %13, [1, 0, 2] : vector<8x4x8xf32> -> vector<4x8x8xf32>
    %15 = arith.truncf %14 : vector<4x8x8xf32> to vector<4x8x8xbf16>
    %16 = vector.extract_strided_slice %7 {offsets = [0, 64], sizes = [8, 32], strides = [1, 1]} : vector<8x96xf32> to vector<8x32xf32>
    %17 = vector.shape_cast %16 : vector<8x32xf32> to vector<8x4x8xf32>
    %18 = tpu.transpose %17, [1, 0, 2] : vector<8x4x8xf32> -> vector<4x8x8xf32>
    %19 = arith.truncf %18 : vector<4x8x8xf32> to vector<4x8x8xbf16>
    "tpu.trace_start"() <{level = 10 : i32, message = "hqd,hkd->hqk"}> : () -> ()
    %cst_6 = arith.constant dense<0.000000e+00> : vector<4x8x8xf32>
    %20 = tpu.matmul %11, %15, %cst_6 {dimension_numbers = #tpu.dot_dimension_numbers<[2], [2], [1], [1], [0, 0, 0, 1, 1, 1], [0], [0]>} : vector<4x8x8xbf16>, vector<4x8x8xbf16>, vector<4x8x8xf32> -> vector<4x8x8xf32>
    "tpu.trace_stop"() : () -> ()
    %cst_7 = arith.constant dense<0xFF800000> : vector<4x8xf32>
    %21 = vector.multi_reduction <maximumf>, %20, %cst_7 [2] : vector<4x8x8xf32> to vector<4x8xf32>
    %22 = vector.shape_cast %21 : vector<4x8xf32> to vector<4x8x1xf32>
    %23 = vector.broadcast %22 : vector<4x8x1xf32> to vector<4x8x8xf32>
    %24 = arith.subf %20, %23 : vector<4x8x8xf32>
    %25 = math.exp %24 : vector<4x8x8xf32>
    %cst_8 = arith.constant dense<0.000000e+00> : vector<4x8xf32>
    %26 = vector.multi_reduction <add>, %25, %cst_8 [2] : vector<4x8x8xf32> to vector<4x8xf32>
    %27 = vector.shape_cast %26 : vector<4x8xf32> to vector<4x8x1xf32>
    %28 = arith.truncf %25 : vector<4x8x8xf32> to vector<4x8x8xbf16>
    "tpu.trace_start"() <{level = 10 : i32, message = "hqk,hkd->hqd"}> : () -> ()
    %cst_9 = arith.constant dense<0.000000e+00> : vector<4x8x8xf32>
    %29 = tpu.matmul %28, %19, %cst_9 {dimension_numbers = #tpu.dot_dimension_numbers<[2], [1], [1], [2], [0, 0, 0, 1, 1, 2], [0], [0]>} : vector<4x8x8xbf16>, vector<4x8x8xbf16>, vector<4x8x8xf32> -> vector<4x8x8xf32>
    "tpu.trace_stop"() : () -> ()
    %30 = tpu.reciprocal %27 {approx = true} : vector<4x8x1xf32> -> vector<4x8x1xf32>
    %31 = vector.broadcast %30 : vector<4x8x1xf32> to vector<4x8x8xf32>
    %32 = arith.mulf %29, %31 : vector<4x8x8xf32>
    %33 = tpu.transpose %32, [1, 0, 2] : vector<4x8x8xf32> -> vector<8x4x8xf32>
    %34 = vector.shape_cast %33 : vector<8x4x8xf32> to vector<8x32xf32>
    %35 = arith.truncf %34 : vector<8x32xf32> to vector<8x32xbf16>
    %c0_10 = arith.constant 0 : index
    %c0_11 = arith.constant 0 : index
    %36 = vector.load %arg4[%c0_10, %c0_11] : memref<32x32xbf16, #tpu.memory_space<vmem>>, vector<32x32xbf16>
    %cst_12 = arith.constant dense<0.000000e+00> : vector<8x32xf32>
    %37 = tpu.matmul %35, %36, %cst_12 {dimension_numbers = #tpu.dot_dimension_numbers<[1], [0], [0], [1], [0, 0, 1, 1], [], []>} : vector<8x32xbf16>, vector<32x32xbf16>, vector<8x32xf32> -> vector<8x32xf32>
    %c0_13 = arith.constant 0 : index
    %c0_14 = arith.constant 0 : index
    %38 = vector.load %arg5[%c0_13, %c0_14] : memref<1x32xf32, #tpu.memory_space<vmem>>, vector<1x32xf32>
    %39 = vector.broadcast %38 : vector<1x32xf32> to vector<8x32xf32>
    %40 = arith.addf %37, %39 : vector<8x32xf32>
    %41 = arith.addf %1, %40 : vector<8x32xf32>
    %c0_15 = arith.constant 0 : index
    %c0_16 = arith.constant 0 : index
    %42 = vector.load %arg10[%c0_15, %c0_16] : memref<1x32xf32, #tpu.memory_space<vmem>>, vector<1x32xf32>
    %c0_17 = arith.constant 0 : index
    %c0_18 = arith.constant 0 : index
    %43 = vector.load %arg11[%c0_17, %c0_18] : memref<1x32xf32, #tpu.memory_space<vmem>>, vector<1x32xf32>
    %cst_19 = arith.constant dense<0.000000e+00> : vector<8xf32>
    %44 = vector.multi_reduction <add>, %41, %cst_19 [1] : vector<8x32xf32> to vector<8xf32>
    %45 = vector.shape_cast %44 : vector<8xf32> to vector<8x1xf32>
    %cst_20 = arith.constant 3.200000e+01 : f32
    %46 = vector.broadcast %cst_20 : f32 to vector<8x1xf32>
    %47 = arith.divf %45, %46 : vector<8x1xf32>
    %48 = vector.broadcast %47 : vector<8x1xf32> to vector<8x32xf32>
    %49 = arith.subf %41, %48 : vector<8x32xf32>
    %50 = arith.mulf %49, %49 : vector<8x32xf32>
    %cst_21 = arith.constant dense<0.000000e+00> : vector<8xf32>
    %51 = vector.multi_reduction <add>, %50, %cst_21 [1] : vector<8x32xf32> to vector<8xf32>
    %52 = vector.shape_cast %51 : vector<8xf32> to vector<8x1xf32>
    %cst_22 = arith.constant 3.200000e+01 : f32
    %53 = vector.broadcast %cst_22 : f32 to vector<8x1xf32>
    %54 = arith.divf %52, %53 : vector<8x1xf32>
    %cst_23 = arith.constant 9.99999996E-13 : f32
    %55 = vector.broadcast %cst_23 : f32 to vector<8x1xf32>
    %56 = arith.addf %54, %55 : vector<8x1xf32>
    %57 = math.rsqrt %56 : vector<8x1xf32>
    %58 = vector.broadcast %57 : vector<8x1xf32> to vector<8x32xf32>
    %59 = arith.mulf %49, %58 : vector<8x32xf32>
    %60 = vector.broadcast %42 : vector<1x32xf32> to vector<8x32xf32>
    %61 = arith.mulf %59, %60 : vector<8x32xf32>
    %62 = vector.broadcast %43 : vector<1x32xf32> to vector<8x32xf32>
    %63 = arith.addf %61, %62 : vector<8x32xf32>
    %64 = arith.truncf %63 : vector<8x32xf32> to vector<8x32xbf16>
    %c0_24 = arith.constant 0 : index
    %c0_25 = arith.constant 0 : index
    %65 = vector.load %arg6[%c0_24, %c0_25] : memref<32x64xbf16, #tpu.memory_space<vmem>>, vector<32x64xbf16>
    %cst_26 = arith.constant dense<0.000000e+00> : vector<8x64xf32>
    %66 = tpu.matmul %64, %65, %cst_26 {dimension_numbers = #tpu.dot_dimension_numbers<[1], [0], [0], [1], [0, 0, 1, 1], [], []>} : vector<8x32xbf16>, vector<32x64xbf16>, vector<8x64xf32> -> vector<8x64xf32>
    %c0_27 = arith.constant 0 : index
    %c0_28 = arith.constant 0 : index
    %67 = vector.load %arg7[%c0_27, %c0_28] : memref<1x64xf32, #tpu.memory_space<vmem>>, vector<1x64xf32>
    %68 = vector.broadcast %67 : vector<1x64xf32> to vector<8x64xf32>
    %69 = arith.addf %66, %68 : vector<8x64xf32>
    %cst_29 = arith.constant 5.000000e-01 : f32
    %70 = vector.broadcast %cst_29 : f32 to vector<8x64xf32>
    %71 = arith.mulf %70, %69 : vector<8x64xf32>
    %cst_30 = arith.constant 0.707106769 : f32
    %72 = vector.broadcast %cst_30 : f32 to vector<8x64xf32>
    %73 = arith.mulf %69, %72 : vector<8x64xf32>
    %74 = math.erf %73 : vector<8x64xf32>
    %cst_31 = arith.constant 1.000000e+00 : f32
    %75 = vector.broadcast %cst_31 : f32 to vector<8x64xf32>
    %76 = arith.addf %75, %74 : vector<8x64xf32>
    %77 = arith.mulf %71, %76 : vector<8x64xf32>
    %78 = arith.truncf %77 : vector<8x64xf32> to vector<8x64xbf16>
    %c0_32 = arith.constant 0 : index
    %c0_33 = arith.constant 0 : index
    %79 = vector.load %arg8[%c0_32, %c0_33] : memref<64x32xbf16, #tpu.memory_space<vmem>>, vector<64x32xbf16>
    %cst_34 = arith.constant dense<0.000000e+00> : vector<8x32xf32>
    %80 = tpu.matmul %78, %79, %cst_34 {dimension_numbers = #tpu.dot_dimension_numbers<[1], [0], [0], [1], [0, 0, 1, 1], [], []>} : vector<8x64xbf16>, vector<64x32xbf16>, vector<8x32xf32> -> vector<8x32xf32>
    %c0_35 = arith.constant 0 : index
    %c0_36 = arith.constant 0 : index
    %81 = vector.load %arg9[%c0_35, %c0_36] : memref<1x32xf32, #tpu.memory_space<vmem>>, vector<1x32xf32>
    %82 = vector.broadcast %81 : vector<1x32xf32> to vector<8x32xf32>
    %83 = arith.addf %80, %82 : vector<8x32xf32>
    %84 = arith.addf %63, %83 : vector<8x32xf32>
    %c0_37 = arith.constant 0 : index
    %c0_38 = arith.constant 0 : index
    %85 = vector.load %arg12[%c0_37, %c0_38] : memref<1x32xf32, #tpu.memory_space<vmem>>, vector<1x32xf32>
    %c0_39 = arith.constant 0 : index
    %c0_40 = arith.constant 0 : index
    %86 = vector.load %arg13[%c0_39, %c0_40] : memref<1x32xf32, #tpu.memory_space<vmem>>, vector<1x32xf32>
    %cst_41 = arith.constant dense<0.000000e+00> : vector<8xf32>
    %87 = vector.multi_reduction <add>, %84, %cst_41 [1] : vector<8x32xf32> to vector<8xf32>
    %88 = vector.shape_cast %87 : vector<8xf32> to vector<8x1xf32>
    %cst_42 = arith.constant 3.200000e+01 : f32
    %89 = vector.broadcast %cst_42 : f32 to vector<8x1xf32>
    %90 = arith.divf %88, %89 : vector<8x1xf32>
    %91 = vector.broadcast %90 : vector<8x1xf32> to vector<8x32xf32>
    %92 = arith.subf %84, %91 : vector<8x32xf32>
    %93 = arith.mulf %92, %92 : vector<8x32xf32>
    %cst_43 = arith.constant dense<0.000000e+00> : vector<8xf32>
    %94 = vector.multi_reduction <add>, %93, %cst_43 [1] : vector<8x32xf32> to vector<8xf32>
    %95 = vector.shape_cast %94 : vector<8xf32> to vector<8x1xf32>
    %cst_44 = arith.constant 3.200000e+01 : f32
    %96 = vector.broadcast %cst_44 : f32 to vector<8x1xf32>
    %97 = arith.divf %95, %96 : vector<8x1xf32>
    %cst_45 = arith.constant 9.99999996E-13 : f32
    %98 = vector.broadcast %cst_45 : f32 to vector<8x1xf32>
    %99 = arith.addf %97, %98 : vector<8x1xf32>
    %100 = math.rsqrt %99 : vector<8x1xf32>
    %101 = vector.broadcast %100 : vector<8x1xf32> to vector<8x32xf32>
    %102 = arith.mulf %92, %101 : vector<8x32xf32>
    %103 = vector.broadcast %85 : vector<1x32xf32> to vector<8x32xf32>
    %104 = arith.mulf %102, %103 : vector<8x32xf32>
    %105 = vector.broadcast %86 : vector<1x32xf32> to vector<8x32xf32>
    %106 = arith.addf %104, %105 : vector<8x32xf32>
    %c0_46 = arith.constant 0 : index
    %c0_47 = arith.constant 0 : index
    %c0_48 = arith.constant 0 : index
    %107 = vector.load %arg14[%c0_46, %c0_47, %c0_48] : memref<1x8x32xf32, #tpu.memory_space<vmem>>, vector<1x8x32xf32>
    %108 = vector.shape_cast %107 : vector<1x8x32xf32> to vector<8x32xf32>
    %109 = vector.shape_cast %106 : vector<8x32xf32> to vector<1x8x32xf32>
    tpu.vector_store %arg14[%c0_46, %c0_47, %c0_48], %109 {strides = array<i32>} : memref<1x8x32xf32, #tpu.memory_space<vmem>>, vector<1x8x32xf32>,
    return
  }
  func.func @transform_0(%arg0: i32) -> (i32, i32, i32) {
    %c0_i32 = arith.constant 0 : i32
    %c0_i32_0 = arith.constant 0 : i32
    %c0_i32_1 = arith.constant 0 : i32
    return %arg0, %c0_i32, %c0_i32_0 : i32, i32, i32
  }
  func.func @transform_1(%arg0: i32) -> (i32, i32) {
    %c0_i32 = arith.constant 0 : i32
    %c0_i32_0 = arith.constant 0 : i32
    %c0_i32_1 = arith.constant 0 : i32
    return %c0_i32, %c0_i32_0 : i32, i32
  }
  func.func @transform_2(%arg0: i32) -> (i32, i32) {
    %c0_i32 = arith.constant 0 : i32
    %c0_i32_0 = arith.constant 0 : i32
    %c0_i32_1 = arith.constant 0 : i32
    return %c0_i32, %c0_i32_0 : i32, i32
  }
  func.func @transform_3(%arg0: i32) -> (i32, i32) {
    %c0_i32 = arith.constant 0 : i32
    %c0_i32_0 = arith.constant 0 : i32
    %c0_i32_1 = arith.constant 0 : i32
    return %c0_i32, %c0_i32_0 : i32, i32
  }
  func.func @transform_4(%arg0: i32) -> (i32, i32) {
    %c0_i32 = arith.constant 0 : i32
    %c0_i32_0 = arith.constant 0 : i32
    %c0_i32_1 = arith.constant 0 : i32
    return %c0_i32, %c0_i32_0 : i32, i32
  }
  func.func @transform_5(%arg0: i32) -> (i32, i32) {
    %c0_i32 = arith.constant 0 : i32
    %c0_i32_0 = arith.constant 0 : i32
    %c0_i32_1 = arith.constant 0 : i32
    return %c0_i32, %c0_i32_0 : i32, i32
  }
  func.func @transform_6(%arg0: i32) -> (i32, i32) {
    %c0_i32 = arith.constant 0 : i32
    %c0_i32_0 = arith.constant 0 : i32
    %c0_i32_1 = arith.constant 0 : i32
    return %c0_i32, %c0_i32_0 : i32, i32
  }
  func.func @transform_7(%arg0: i32) -> (i32, i32) {
    %c0_i32 = arith.constant 0 : i32
    %c0_i32_0 = arith.constant 0 : i32
    %c0_i32_1 = arith.constant 0 : i32
    return %c0_i32, %c0_i32_0 : i32, i32
  }
  func.func @transform_8(%arg0: i32) -> (i32, i32) {
    %c0_i32 = arith.constant 0 : i32
    %c0_i32_0 = arith.constant 0 : i32
    %c0_i32_1 = arith.constant 0 : i32
    return %c0_i32, %c0_i32_0 : i32, i32
  }
  func.func @transform_9(%arg0: i32) -> (i32, i32) {
    %c0_i32 = arith.constant 0 : i32
    %c0_i32_0 = arith.constant 0 : i32
    %c0_i32_1 = arith.constant 0 : i32
    return %c0_i32, %c0_i32_0 : i32, i32
  }
  func.func @transform_10(%arg0: i32) -> (i32, i32) {
    %c0_i32 = arith.constant 0 : i32
    %c0_i32_0 = arith.constant 0 : i32
    %c0_i32_1 = arith.constant 0 : i32
    return %c0_i32, %c0_i32_0 : i32, i32
  }
  func.func @transform_11(%arg0: i32) -> (i32, i32) {
    %c0_i32 = arith.constant 0 : i32
    %c0_i32_0 = arith.constant 0 : i32
    %c0_i32_1 = arith.constant 0 : i32
    return %c0_i32, %c0_i32_0 : i32, i32
  }
  func.func @transform_12(%arg0: i32) -> (i32, i32) {
    %c0_i32 = arith.constant 0 : i32
    %c0_i32_0 = arith.constant 0 : i32
    %c0_i32_1 = arith.constant 0 : i32
    return %c0_i32, %c0_i32_0 : i32, i32
  }
  func.func @transform_13(%arg0: i32) -> (i32, i32, i32) {
    %c0_i32 = arith.constant 0 : i32
    %c0_i32_0 = arith.constant 0 : i32
    %c0_i32_1 = arith.constant 0 : i32
    return %arg0, %c0_i32, %c0_i32_0 : i32, i32, i32
  }
}

</mosaic_0001>

<bundles_post_ra>
// kernel: tpu_custom_call.1
= control target key start
LH: loop header
LB: loop body
LE: loop exit
PB: predicated region body
PF: predicated region fallthrough
CT: control target
= control target key end

     0   :  { %s2679_s0 = inlined_call_operand.vmem [shape: f32[2,8,32], index: 0, kind: input, shape index: {}]   ;;  %s2680_s1 = inlined_call_operand.vmem [shape: bf16[32,96], index: 1, kind: input, shape index: {}]   ;;  %s2681_s2 = inlined_call_operand.vmem [shape: f32[1,96], index: 2, kind: input, shape index: {}]   ;;  %s2682_s3 = inlined_call_operand.vmem [shape: bf16[32,32], index: 3, kind: input, shape index: {}]   ;;  %s2683_s4 = inlined_call_operand.vmem [shape: f32[1,32], index: 4, kind: input, shape index: {}]   ;;  %s2684_s5 = inlined_call_operand.hbm [shape: bf16[32,64], index: 5, kind: input, shape index: {}]   ;;  %s2685_s6 = inlined_call_operand.vmem [shape: f32[1,64], index: 6, kind: input, shape index: {}]   ;;  %s2686_s7 = inlined_call_operand.vmem [shape: bf16[64,32], index: 7, kind: input, shape index: {}]   ;;  %s2687_s8 = inlined_call_operand.vmem [shape: f32[1,32], index: 8, kind: input, shape index: {}]   ;;  %s2688_s9 = inlined_call_operand.vmem [shape: f32[1,32], index: 9, kind: input, shape index: {}]   ;;  %s2689_s10 = inlined_call_operand.vmem [shape: f32[1,32], index: 10, kind: input, shape index: {}]   ;;  %s2690_s11 = inlined_call_operand.vmem [shape: f32[1,32], index: 11, kind: input, shape index: {}]   ;;  %s2691_s12 = inlined_call_operand.vmem [shape: f32[1,32], index: 12, kind: input, shape index: {}]   ;;  %s2692_s13 = inlined_call_operand.hbm [shape: f32[2,8,32], index: 13, kind: output, shape index: {}]  }
   0x1   :  { %2693 = sst [smem:[#allocation8_spill]] %s2679_s0 }
   0x2   :  { %2694 = sst [smem:[#allocation9_spill]] %s2680_s1 }
   0x3   :  { %2695 = sst [smem:[#allocation10_spill]] %s2681_s2 }
   0x4   :  { %2696 = sst [smem:[#allocation11_spill]] %s2682_s3 }
   0x5   :  { %2697 = sst [smem:[#allocation12_spill]] %s2684_s5 }
   0x6   :  { %18 = vsyncpa [#allocation3], 0 }
   0x7   :  { %19 = vsyncpa [#allocation4], 0 }
   0x8   :  { %21 = vsyncpa [#allocation4 + $0x1], 0  ;;  %s2354_s25 = smov 0   ;;  %s2356_s26 = smov 0  }
   0x9   :  { %s2358_s27 = smov 0   ;;  %s2360_s28 = smov 0  }
   0xa LB: > { %s2375_s29 = sadd.s32 4294967295, %s2266_s28   ;;  %s1916_s30 = sadd.s32 4294967294, %s2266_s28   ;;  %s2266_s28 = sphi %s2360_s28, %s2710_s28   ;;  %s2262_s27 = sphi %s2358_s27, %s2709_s27   ;;  %s2258_s26 = sphi %s2356_s26, %s2708_s26   ;;  %s2254_s25 = sphi %s2354_s25, %s2707_s25  }
   0xb   : > { %s2379_s14 = sadd.s32 1, %s2266_s28   ;;  %s312_s15 = sadd.s32 1, %s2262_s27 }
   0xc   : > { %s309_s16 = ssub.s32 %s2266_s28, %s2379_s14  ;;  %p322_p0 = scmp.ne.s32.totalorder %s2262_s27, %s2258_s26 }
   0xd   : > { %p310_p1 = scmp.eq.s32.totalorder %s309_s16, 0  ;;  %p323_p2 = scmp.eq.s32.totalorder %s2375_s29, 1 }
   0xe   : > { %p328_p3 = scmp.ne.s32.totalorder %s2258_s26, %s2254_s25  ;;  %p329_p4 = scmp.eq.s32.totalorder %s1916_s30, 1 }
   0xf   : > { %s2390_s17 = scalar_select %p310_p1, %s2262_s27, %s312_s15  }
  0x10   : > { %p2392_p5 = por %p323_p2, %p322_p0  ;;  %p2396_p6 = por %p329_p4, %p328_p3 }
  0x11   : > { %p1917_p7 = scmp.ge.s32.totalorder %s2266_s28, 1  ;;  %p336_p8 = scmp.lt.s32.totalorder %s2266_s28, 3 }
  0x12   : > { %s2699_s19 = scalar_select %p2396_p6, 1, 0 }
  0x13   : > { %p2094_p9 = scmp.eq.s32.totalorder %s2375_s29, 0  ;;  %p2403_p10 = pnand %p1917_p7, %p336_p8 }
  0x14   : > { %s2268_s21 = smov [#allocation2]  }
  0x15   : > { %s360_s22 = sshll.u32 %s2268_s21, 4  ;;  %p2086_p11 = pneg %p2403_p10  ;;  %s361_s22 = int_to_ptr.vmem [resolvable:$true] %s360_s22 }
  0x16   : > { %s2187_s23 = scalar_lea.vmem %s361_s22, 256  ;;  %p2195_p3 = scmp.lt.s32.totalorder %s361_s22, %s361_s22 }
  0x17   : > { %p2087_p12 = pnand %p2094_p9, %p2086_p11  ;;  %p2188_p0 = scmp.ne.s32.totalorder %s361_s22, %s2187_s23 }
  0x18   : > { %p2196_p4 = scmp.lt.s32.totalorder %s2187_s23, %s2187_s23 }
  0x19   : > { %p2178_p13 = pneg %p2087_p12 }
  0x1a   : > { %p2197_p6 = por %p2196_p4, %p2195_p3 }
  0x1b   : > { %p2190_p1 = pnand %p2188_p0, %p2178_p13 }
  0x1d   : > { %p2191_p2 = pneg %p2190_p1 }
  0x1f   : > { %p2198_p7 = pnand %p2197_p6, %p2191_p2 }
  0x21   : > { %2201 = shalt.err (!%p2198_p7)
}
  0x22   : > { %s2269_s24 = smov 64   ;;  %s2270_s30 = smov 4  }
  0x23   : > { %s2701_s5 = sld [smem:[#allocation12_spill]] }
  0x25   : > { %404 = sbr.rel (%p2403_p10) target bundleno = 2498 (0x9c2), region = 72 }
  0x29   : > { %2089 = dma.hbm_to_vmem [thread:$0]  (!%p2087_p12), %s2701_s5, 256, %s361_s22, [#allocation3], %s2269_s24, %s2269_s24, %s2270_s30  }
  0x2a   : > { %2245 = dma.done.wait (%p2094_p9), [#allocation3], 256  }
  0x2b   : > { %2247 = vsyncadd (%p2094_p9), [#allocation3], 4294967040  ;;  %p447_p8 = scmp.lt.s32.totalorder %s2375_s29, 1  ;;  %v2271_v0 = vmov 0.0   ;;  %vm2272_vm0 = vmmov 0   ;;  %s2702_s0 = sld [smem:[#allocation8_spill]]  ;;  %v536_v16 = vlaneseq }
  0x2c   : > { %1996 = vmatprep.subr.bf16.mxu0 %v2271_v0  ;;  %2000 = vmatprep.mubr.msk.bf16.mxu0 %vm2272_vm0, %v2271_v0  ;;  %s2703_s1 = sld [smem:[#allocation9_spill]]  ;;  %vm477_vm1 = vcmask 261120   ;;  %s2273_s5 = smov 104   ;;  %v2278_v14 = vmov 1983009808   ;;  %vm975_vm2 = vcmask 64512  }
  0x2d   : > { %s448_s21 = scalar_select %p447_p8, %s2375_s29, 1  ;;  %2004 = vmatprep.subr.bf16.mxu1 %v2271_v0  ;;  %2006 = vmatprep.mubr.msk.bf16.mxu1 %vm2272_vm0, %v2271_v0  ;;  %v534_v15 = vunpack.c.l.s4 %v2278_v14  ;;  %v537_v18 = vshrl.u32 %v536_v16, 7  ;;  %v2279_v19 = vmov 1934713408   ;;  %vm1203_vm3 = vcmask 1043456  }
  0x2e   : > { %s2704_s2 = sld [smem:[#allocation10_spill]]  ;;  %s2274_s22 = smov 120   ;;  %v566_v20 = vunpack.c.l.s4 %v2279_v19  ;;  %vm1542_vm4 = vcmask 130048   ;;  %vm1544_vm5 = vcmask 195584   ;;  %vm1756_vm6 = vcmask 523264  }
  0x2f   : > { %s1923_s20 = sshll.u32 %s448_s21, 3  ;;  %s2275_s23 = smov 96   ;;  %v535_v17 = vunpack.c.0.s8 %v534_v15 }
  0x30   : > { %s2277_s30 = smov 64   ;;  %v567_v26 = vunpack.c.0.s8 %v566_v20  ;;  %s2705_s3 = sld [smem:[#allocation11_spill]] }
  0x31   : > { %s450_s24 = scalar_lea.vmem %s2702_s0, %s1923_s20  ;;  %v2459_v23 = vsub.s32 %v535_v17, %v537_v18  ;;  %s2283_s16 = smov [#allocation5]  }
  0x32   : > { %v2144_v1 = vld [vmem:[%s2703_s1 + $0x8] sm:$0xff]   ;;  %v2145_v2 = vld [vmem:[%s2703_s1] sm:$0xff]   ;;  %v2467_v33 = vsub.s32 %v567_v26, %v537_v18  ;;  %s2206_s21 = sshll.u32 %s2283_s16, 4  ;;  %s2207_s21 = int_to_ptr.vmem [resolvable:$false] %s2206_s21 }
  0x33   : > { %1997 = vmatpush3.bf16.msra.mxu0 %v2144_v1  ;;  %v2437_v3 = vld [vmem:[%s450_s24] sm:$0xff]  ;;  %s2276_s24 = smov 112  }
  0x34   : > { %1998 = vmatprep.subr.bf16.mxu0 %v2271_v0  ;;  %v453_v4 = vpack.c.bf16 %v2437_v3, %v2437_v3  ;;  %v1924_v5 = vld [vmem:[%s2704_s2] ss:$0 sm:$0xff] }
  0x37   : > { %1999 = vmatpush3.bf16.msra.mxu0 %v2145_v2 }
  0x38   : > { %2010 = vmatprep.subr.bf16.mxu0 %v2271_v0 }
  0x3a   : > { %2001 = vmatmul.mubr.msk.bf16.vlgmr.msra.gmra.mxu0 %vm477_vm1, %v453_v4 }
  0x3b   : > { %2012 = vmatprep.mubr.msk.bf16.mxu0 %vm2272_vm0, %v2271_v0 }
  0xfa   : > { %v515_v6 = vpop.f32.mrf.mxu0 }
  0xfb   : > { %v516_v7 = vadd.f32 %v1924_v5, %v515_v6 }
  0xfc   : > { %v2002_v8 = vpop.f32.mrf.mxu0 }
  0xfd   : > { %528 = vrot.lane.b32.xlu1 %v516_v7, %s2273_s5  ;;  %522 = vrot.lane.b32.xlu0 %v516_v7, %s2274_s22  ;;  %s2280_s5 = smov 16   ;;  %s2281_s22 = smov 8  }
  0xfe   : > { %v518_v9 = vpop.f32.mrf.mxu0 }
 0x100   : > { %v2003_v10 = vpop.f32.mrf.mxu0 }
 0x101   : > { %671 = vrot.lane.b32.xlu1 %v516_v7, %s2275_s23  ;;  %525 = vrot.lane.b32.xlu0 %v516_v7, %s2276_s24  ;;  %s444_s24 = sand.u32 1, %s2258_s26  }
 0x16f   : > { %v523_v11 = vpop.permute.xlu0 %522  ;;  %v2449_v12 = vpop.permute.xlu1 %528 }
 0x170   : > { %673 = vrot.lane.b32.xlu0 %v523_v11, %s2275_s23  ;;  %v547_v24 = vcombine.low %v523_v11, %v2449_v12  ;;  %v548_v25 = vcombine.high %v523_v11, %v2449_v12 }
 0x172   : > { %v555_v29 = vrot.slane %v547_v24, %v2459_v23  ;;  %v562_v30 = vrot.slane %v548_v25, %v2459_v23 }
 0x173   : > { %v2451_v13 = vpop.permute.xlu0 %525  ;;  %v672_v31 = vpop.permute.xlu1 %671 }
 0x174   : > { %677 = vrot.lane.b32.xlu0 %v2449_v12, %s2275_s23  ;;  %675 = vrot.lane.b32.xlu1 %v2451_v13, %s2275_s23  ;;  %v531_v21 = vcombine.low %v516_v7, %v2451_v13  ;;  %v532_v22 = vcombine.high %v516_v7, %v2451_v13  ;;  %s2282_s23 = smov 24  }
 0x176   : > { %v539_v27 = vrot.slane %v531_v21, %v2459_v23  ;;  %v546_v28 = vrot.slane %v532_v22, %v2459_v23 }
 0x178   : > { %823 = vrot.lane.b32.xlu0 %v516_v7, %s2277_s30  ;;  %825 = vrot.lane.b32.xlu1 %v523_v11, %s2277_s30  ;;  %v563_v34 = vcombine.low %v539_v27, %v555_v29  ;;  %v564_v35 = vcombine.high %v539_v27, %v555_v29  ;;  %v579_v36 = vcombine.low %v546_v28, %v562_v30 }
 0x179   : > { %v580_v37 = vcombine.high %v546_v28, %v562_v30 }
 0x17a   : > { %v571_v44 = vrot.slane %v563_v34, %v2467_v33  ;;  %v578_v45 = vrot.slane %v564_v35, %v2467_v33  ;;  %v587_v46 = vrot.slane %v579_v36, %v2467_v33 }
 0x17b   : > { %v594_v47 = vrot.slane %v580_v37, %v2467_v33 }
 0x17c   : > { %v599_v56 = vcombine.low %v571_v44, %v578_v45  ;;  %v1928_v57 = vcombine.high %v571_v44, %v578_v45 }
 0x17d   : > { %v615_v58 = vcombine.low %v587_v46, %v594_v47  ;;  %v1929_v59 = vcombine.high %v587_v46, %v594_v47 }
 0x17e   : > { %v606_v6 = vrot.slane %v599_v56, %v2459_v23  ;;  %v614_v7 = vrot.slane %v1928_v57, %v2459_v23 }
 0x17f   : > { %v622_v8 = vrot.slane %v615_v58, %v2459_v23  ;;  %v630_v9 = vrot.slane %v1929_v59, %v2459_v23 }
 0x180   : > { %v631_v22 = vcombine.low %v606_v6, %v614_v7 }
 0x181   : > { %v647_v24 = vcombine.low %v622_v8, %v630_v9 }
 0x1e2   : > { %v674_v32 = vpop.permute.xlu0 %673 }
 0x1e6   : > { %v676_v38 = vpop.permute.xlu1 %675  ;;  %v678_v39 = vpop.permute.xlu0 %677 }
 0x1e7   : > { %v683_v40 = vcombine.low %v672_v31, %v676_v38  ;;  %v684_v41 = vcombine.high %v672_v31, %v676_v38  ;;  %v699_v42 = vcombine.low %v674_v32, %v678_v39  ;;  %v700_v43 = vcombine.high %v674_v32, %v678_v39 }
 0x1e8   : > { %v639_v31 = vrot.slane %v631_v22, %v2467_v33  ;;  %v655_v32 = vrot.slane %v647_v24, %v2467_v33  ;;  %v632_v38 = vcombine.high %v606_v6, %v614_v7  ;;  %v648_v39 = vcombine.high %v622_v8, %v630_v9 }
 0x1e9   : > { %v691_v48 = vrot.slane %v683_v40, %v2459_v23  ;;  %v698_v49 = vrot.slane %v684_v41, %v2459_v23  ;;  %v707_v50 = vrot.slane %v699_v42, %v2459_v23  ;;  %v714_v51 = vrot.slane %v700_v43, %v2459_v23 }
 0x1ea   : > { %v663_v40 = vcombine.low %v639_v31, %v655_v32  ;;  %v664_v41 = vcombine.high %v639_v31, %v655_v32  ;;  %v646_v46 = vrot.slane %v632_v38, %v2467_v33  ;;  %v662_v47 = vrot.slane %v648_v39, %v2467_v33 }
 0x1eb   : > { %v715_v52 = vcombine.low %v691_v48, %v707_v50  ;;  %v716_v53 = vcombine.high %v691_v48, %v707_v50  ;;  %v731_v54 = vcombine.low %v698_v49, %v714_v51  ;;  %v732_v55 = vcombine.high %v698_v49, %v714_v51 }
 0x1ec   : > { %v667_v44 = vpack.c.bf16 %v663_v40, %v663_v40  ;;  %v668_v45 = vpack.c.bf16 %v664_v41, %v664_v41  ;;  %v665_v50 = vcombine.low %v646_v46, %v662_v47  ;;  %v666_v51 = vcombine.high %v646_v46, %v662_v47 }
 0x1ed   : > { %v723_v60 = vrot.slane %v715_v52, %v2467_v33  ;;  %v730_v61 = vrot.slane %v716_v53, %v2467_v33  ;;  %v739_v62 = vrot.slane %v731_v54, %v2467_v33  ;;  %v746_v63 = vrot.slane %v732_v55, %v2467_v33 }
 0x1ee   : > { %v669_v52 = vpack.c.bf16 %v665_v50, %v665_v50  ;;  %v670_v53 = vpack.c.bf16 %v666_v51, %v666_v51 }
 0x1ef   : > { %v751_v1 = vcombine.low %v723_v60, %v730_v61  ;;  %v1930_v2 = vcombine.high %v723_v60, %v730_v61  ;;  %v767_v4 = vcombine.low %v739_v62, %v746_v63  ;;  %v1931_v5 = vcombine.high %v739_v62, %v746_v63 }
 0x1f1   : > { %v758_v10 = vrot.slane %v751_v1, %v2459_v23  ;;  %v766_v11 = vrot.slane %v1930_v2, %v2459_v23  ;;  %v774_v14 = vrot.slane %v767_v4, %v2459_v23  ;;  %v782_v15 = vrot.slane %v1931_v5, %v2459_v23 }
 0x1f3   : > { %v783_v16 = vcombine.low %v758_v10, %v766_v11  ;;  %v799_v17 = vcombine.low %v774_v14, %v782_v15  ;;  %v784_v18 = vcombine.high %v758_v10, %v766_v11  ;;  %v800_v19 = vcombine.high %v774_v14, %v782_v15  ;;  %v826_v14 = vpop.permute.xlu1 %825  ;;  %v824_v15 = vpop.permute.xlu0 %823 }
 0x1f5   : > { %v791_v20 = vrot.slane %v783_v16, %v2467_v33  ;;  %v807_v21 = vrot.slane %v799_v17, %v2467_v33  ;;  %v798_v27 = vrot.slane %v784_v18, %v2467_v33  ;;  %v814_v28 = vrot.slane %v800_v19, %v2467_v33 }
 0x1f7   : > { %v815_v25 = vcombine.low %v791_v20, %v807_v21  ;;  %v816_v26 = vcombine.high %v791_v20, %v807_v21  ;;  %v817_v36 = vcombine.low %v798_v27, %v814_v28  ;;  %v818_v37 = vcombine.high %v798_v27, %v814_v28 }
 0x1f9   : > { %v819_v29 = vpack.c.bf16 %v815_v25, %v815_v25  ;;  %v820_v30 = vpack.c.bf16 %v816_v26, %v816_v26  ;;  %v821_v42 = vpack.c.bf16 %v817_v36, %v817_v36  ;;  %v822_v43 = vpack.c.bf16 %v818_v37, %v818_v37 }
 0x1fb   : > { %v980_v34 = vsel %vm975_vm2, %v819_v29, 0  ;;  %v1026_v35 = vsel %vm975_vm2, %v820_v30, 0  ;;  %v1072_v48 = vsel %vm975_vm2, %v821_v42, 0  ;;  %v1118_v49 = vsel %vm975_vm2, %v822_v43, 0 }
 0x1fc   : > { %2005 = vmatpush3.bf16.xpose.msra.mxu1 %v980_v34  ;;  %2011 = vmatpush3.bf16.xpose.msra.mxu0 %v1026_v35 }
 0x1fd   : > { %2016 = vmatprep.subr.bf16.mxu1 %v2271_v0  ;;  %2022 = vmatprep.subr.bf16.mxu0 %v2271_v0 }
 0x203   : > { %2007 = vmatmul.mubr.msk.bf16.vlgmr.msra.gmra.mxu1 %vm975_vm2, %v667_v44  ;;  %2013 = vmatmul.mubr.msk.bf16.vlgmr.msra.gmra.mxu0 %vm975_vm2, %v668_v45 }
 0x204   : > { %2017 = vmatpush3.bf16.xpose.msra.mxu1 %v1072_v48  ;;  %2023 = vmatpush3.bf16.xpose.msra.mxu0 %v1118_v49 }
 0x205   : > { %2018 = vmatprep.mubr.msk.bf16.mxu1 %vm2272_vm0, %v2271_v0  ;;  %2024 = vmatprep.mubr.msk.bf16.mxu0 %vm2272_vm0, %v2271_v0 }
 0x206   : > { %2028 = vmatprep.subr.bf16.mxu1 %v2271_v0  ;;  %2034 = vmatprep.subr.bf16.mxu0 %v2271_v0 }
 0x20b   : > { %2019 = vmatmul.mubr.msk.bf16.vlgmr.msra.gmra.mxu1 %vm975_vm2, %v669_v52  ;;  %2025 = vmatmul.mubr.msk.bf16.vlgmr.msra.gmra.mxu0 %vm975_vm2, %v670_v53 }
 0x20c   : > { %2030 = vmatprep.mubr.msk.bf16.mxu1 %vm2272_vm0, %v2271_v0  ;;  %2036 = vmatprep.mubr.msk.bf16.mxu0 %vm2272_vm0, %v2271_v0 }
 0x2c3   : > { %v1016_v54 = vpop.f32.mrf.mxu1  ;;  %v1062_v55 = vpop.f32.mrf.mxu0 }
 0x2c4   : > { %v1160_v56 = vsel %vm975_vm2, %v1016_v54, -inf  ;;  %v1163_v57 = vsel %vm975_vm2, %v1062_v55, -inf }
 0x2c5   : > { %1161 = vmax.xlane.f32.xlu1 %v1160_v56  ;;  %v2008_v58 = vpop.f32.mrf.mxu1  ;;  %1164 = vmax.xlane.f32.xlu0 %v1163_v57  ;;  %v2014_v59 = vpop.f32.mrf.mxu0 }
 0x2c7   : > { %v1019_v60 = vpop.f32.mrf.mxu1  ;;  %v1065_v61 = vpop.f32.mrf.mxu0 }
 0x2c9   : > { %v2009_v62 = vpop.f32.mrf.mxu1  ;;  %v2015_v63 = vpop.f32.mrf.mxu0 }
 0x2cb   : > { %v2519_v1 = vpop.f32.mrf.mxu1  ;;  %v2521_v2 = vpop.f32.mrf.mxu0 }
 0x2cc   : > { %v1166_v10 = vsel %vm975_vm2, %v2519_v1, -inf  ;;  %v1169_v11 = vsel %vm975_vm2, %v2521_v2, -inf }
 0x2cd   : > { %v2020_v4 = vpop.f32.mrf.mxu1  ;;  %v2026_v5 = vpop.f32.mrf.mxu0 }
 0x2cf   : > { %v1111_v6 = vpop.f32.mrf.mxu1  ;;  %v1157_v7 = vpop.f32.mrf.mxu0 }
 0x2d1   : > { %v2021_v8 = vpop.f32.mrf.mxu1  ;;  %v2027_v9 = vpop.f32.mrf.mxu0 }
 0x2d6   : > { %827 = vrot.lane.b32.xlu1 %v2451_v13, %s2277_s30 }
 0x2db   : > { %829 = vrot.lane.b32.xlu0 %v2449_v12, %s2277_s30  ;;  %s1922_s30 = sshll.u32 %s444_s24, 3 }
 0x2fa   : > { %1167 = vmax.xlane.f32.xlu1 %v1166_v10  ;;  %1170 = vmax.xlane.f32.xlu0 %v1169_v11 }
 0x34e   : > { %v1162_v16 = vpop.xlane.xlu1 %1161  ;;  %v1165_v17 = vpop.xlane.xlu0 %1164 }
 0x34f   : > { %v1172_v18 = vsub.f32 %v1016_v54, %v1162_v16  ;;  %v1173_v19 = vsub.f32 %v1062_v55, %v1165_v17 }
 0x351   : > { %v1176_v20 = vmul.f32 1.442695, %v1172_v18  ;;  %v1178_v21 = vmul.f32 1.442695, %v1173_v19 }
 0x352   : > { %v828_v13 = vpop.permute.xlu1 %827  ;;  %v830_v22 = vpop.permute.xlu0 %829 }
 0x353   : > { %2154 = vpow2.f32 %v1176_v20  ;;  %v835_v12 = vcombine.low %v824_v15, %v828_v13  ;;  %v836_v24 = vcombine.high %v824_v15, %v828_v13  ;;  %v851_v25 = vcombine.low %v826_v14, %v830_v22 }
 0x354   : > { %2156 = vpow2.f32 %v1178_v21  ;;  %v852_v26 = vcombine.high %v826_v14, %v830_v22 }
 0x355   : > { %v843_v27 = vrot.slane %v835_v12, %v2459_v23  ;;  %v850_v28 = vrot.slane %v836_v24, %v2459_v23  ;;  %v859_v29 = vrot.slane %v851_v25, %v2459_v23 }
 0x356   : > { %v866_v30 = vrot.slane %v852_v26, %v2459_v23 }
 0x357   : > { %v867_v31 = vcombine.low %v843_v27, %v859_v29  ;;  %v868_v32 = vcombine.high %v843_v27, %v859_v29 }
 0x358   : > { %v883_v34 = vcombine.low %v850_v28, %v866_v30  ;;  %v884_v35 = vcombine.high %v850_v28, %v866_v30 }
 0x359   : > { %v875_v36 = vrot.slane %v867_v31, %v2467_v33  ;;  %v882_v37 = vrot.slane %v868_v32, %v2467_v33 }
 0x35a   : > { %v891_v38 = vrot.slane %v883_v34, %v2467_v33  ;;  %v898_v39 = vrot.slane %v884_v35, %v2467_v33 }
 0x35b   : > { %v903_v40 = vcombine.low %v875_v36, %v882_v37  ;;  %v1932_v41 = vcombine.high %v875_v36, %v882_v37 }
 0x35c   : > { %v919_v42 = vcombine.low %v891_v38, %v898_v39  ;;  %v1933_v43 = vcombine.high %v891_v38, %v898_v39 }
 0x35d   : > { %v910_v44 = vrot.slane %v903_v40, %v2459_v23  ;;  %v918_v45 = vrot.slane %v1932_v41, %v2459_v23 }
 0x35e   : > { %v926_v46 = vrot.slane %v919_v42, %v2459_v23  ;;  %v934_v47 = vrot.slane %v1933_v43, %v2459_v23 }
 0x35f   : > { %v935_v48 = vcombine.low %v910_v44, %v918_v45  ;;  %v936_v49 = vcombine.high %v910_v44, %v918_v45 }
 0x360   : > { %v2155_v50 = vpop.eup %2154  ;;  %v951_v51 = vcombine.low %v926_v46, %v934_v47  ;;  %v952_v52 = vcombine.high %v926_v46, %v934_v47 }
 0x361   : > { %v2157_v53 = vpop.eup %2156  ;;  %v1184_v54 = vsel %vm975_vm2, %v2155_v50, 0.0  ;;  %v943_v55 = vrot.slane %v935_v48, %v2467_v33  ;;  %v950_v56 = vrot.slane %v936_v49, %v2467_v33  ;;  %v1196_v10 = vpack.c.bf16 %v2155_v50, %v2155_v50 }
 0x362   : > { %v1187_v57 = vsel %vm975_vm2, %v2157_v53, 0.0  ;;  %1185 = vadd.xlane.f32.xlu0 %v1184_v54  ;;  %v959_v58 = vrot.slane %v951_v51, %v2467_v33  ;;  %v966_v59 = vrot.slane %v952_v52, %v2467_v33  ;;  %v1197_v11 = vpack.c.bf16 %v2157_v53, %v2157_v53 }
 0x363   : > { %1188 = vadd.xlane.f32.xlu1 %v1187_v57 }
 0x364   : > { %v967_v60 = vcombine.low %v943_v55, %v959_v58  ;;  %v968_v61 = vcombine.high %v943_v55, %v959_v58  ;;  %v969_v62 = vcombine.low %v950_v56, %v966_v59  ;;  %v970_v63 = vcombine.high %v950_v56, %v966_v59 }
 0x366   : > { %v971_v4 = vpack.c.bf16 %v967_v60, %v967_v60  ;;  %v972_v5 = vpack.c.bf16 %v968_v61, %v968_v61  ;;  %v973_v8 = vpack.c.bf16 %v969_v62, %v969_v62  ;;  %v974_v9 = vpack.c.bf16 %v970_v63, %v970_v63  ;;  %v2146_v62 = vld [vmem:[%s2705_s3 + $0x8] sm:$0xff]  }
 0x368   : > { %v1205_v6 = vsel %vm1203_vm3, %v971_v4, 0  ;;  %v1251_v7 = vsel %vm1203_vm3, %v972_v5, 0  ;;  %v1297_v14 = vsel %vm1203_vm3, %v973_v8, 0  ;;  %v1343_v15 = vsel %vm1203_vm3, %v974_v9, 0 }
 0x369   : > { %2029 = vmatpush3.bf16.msra.mxu1 %v1205_v6  ;;  %2035 = vmatpush3.bf16.msra.mxu0 %v1251_v7 }
 0x36a   : > { %2040 = vmatprep.subr.bf16.mxu1 %v2271_v0  ;;  %2046 = vmatprep.subr.bf16.mxu0 %v2271_v0 }
 0x36c   : > { %2031 = vmatmul.mubr.msk.bf16.vlgmr.msra.gmra.mxu1 %vm975_vm2, %v1196_v10  ;;  %2037 = vmatmul.mubr.msk.bf16.vlgmr.msra.gmra.mxu0 %vm975_vm2, %v1197_v11  ;;  %v2147_v11 = vld [vmem:[%s2705_s3] sm:$0xff]   ;;  %s1832_s3 = scalar_lea.sflag [#allocation4], %s444_s24 }
 0x36d   : > { %2041 = vmatpush3.bf16.msra.mxu1 %v1297_v14  ;;  %2047 = vmatpush3.bf16.msra.mxu0 %v1343_v15 }
 0x36e   : > { %2042 = vmatprep.mubr.msk.bf16.mxu1 %vm2272_vm0, %v2271_v0  ;;  %2048 = vmatprep.mubr.msk.bf16.mxu0 %vm2272_vm0, %v2271_v0 }
 0x36f   : > { %2052 = vmatprep.subr.bf16.mxu1 %v2271_v0  ;;  %2060 = vmatprep.subr.bf16.mxu0 %v2271_v0 }
 0x383   : > { %v1168_v16 = vpop.xlane.xlu1 %1167  ;;  %v1171_v17 = vpop.xlane.xlu0 %1170 }
 0x384   : > { %v1174_v18 = vsub.f32 %v2519_v1, %v1168_v16  ;;  %v1175_v19 = vsub.f32 %v2521_v2, %v1171_v17 }
 0x386   : > { %v1180_v20 = vmul.f32 1.442695, %v1174_v18  ;;  %v1182_v21 = vmul.f32 1.442695, %v1175_v19 }
 0x388   : > { %2158 = vpow2.f32 %v1180_v20 }
 0x389   : > { %2160 = vpow2.f32 %v1182_v21 }
 0x395   : > { %v2159_v13 = vpop.eup %2158 }
 0x396   : > { %v2161_v22 = vpop.eup %2160  ;;  %v1190_v12 = vsel %vm975_vm2, %v2159_v13, 0.0  ;;  %v1198_v24 = vpack.c.bf16 %v2159_v13, %v2159_v13 }
 0x397   : > { %1191 = vadd.xlane.f32.xlu0 %v1190_v12  ;;  %v1193_v25 = vsel %vm975_vm2, %v2161_v22, 0.0  ;;  %v1199_v26 = vpack.c.bf16 %v2161_v22, %v2161_v22 }
 0x398   : > { %1194 = vadd.xlane.f32.xlu1 %v1193_v25  ;;  %2043 = vmatmul.mubr.msk.bf16.vlgmr.msra.gmra.mxu1 %vm975_vm2, %v1198_v24 }
 0x399   : > { %2049 = vmatmul.mubr.msk.bf16.vlgmr.msra.gmra.mxu0 %vm975_vm2, %v1199_v26  ;;  %2056 = vmatprep.mubr.msk.bf16.mxu1 %vm2272_vm0, %v2271_v0 }
 0x39a   : > { %2064 = vmatprep.mubr.msk.bf16.mxu0 %vm2272_vm0, %v2271_v0  ;;  %2053 = vmatpush3.bf16.msra.mxu1 %v2146_v62  ;;  %v2151_v62 = vld [vmem:[%s2686_s7 + $0x10] sm:$0xff]  }
 0x39b   : > { %2054 = vmatprep.subr.bf16.mxu1 %v2271_v0 }
 0x39e   : > { %2055 = vmatpush3.bf16.msra.mxu1 %v2147_v11 }
 0x39f   : > { %2068 = vmatprep.subr.bf16.mxu1 %v2271_v0 }
 0x3eb   : > { %v1186_v34 = vpop.xlane.xlu0 %1185 }
 0x3ec   : > { %v1189_v35 = vpop.xlane.xlu1 %1188  ;;  %2162 = vrcp.f32 %v1186_v34 }
 0x3ed   : > { %2164 = vrcp.f32 %v1189_v35 }
 0x3f9   : > { %v2163_v38 = vpop.eup %2162 }
 0x3fa   : > { %v2165_v39 = vpop.eup %2164 }
 0x420   : > { %v1192_v36 = vpop.xlane.xlu0 %1191 }
 0x421   : > { %v1195_v37 = vpop.xlane.xlu1 %1194  ;;  %2166 = vrcp.f32 %v1192_v36 }
 0x422   : > { %2168 = vrcp.f32 %v1195_v37  ;;  %v1944_v37 = vld [vmem:[%s2683_s4] ss:$0 sm:$0xff] }
 0x42c   : > { %v1241_v1 = vpop.f32.mrf.mxu1  ;;  %v1287_v2 = vpop.f32.mrf.mxu0 }
 0x42d   : > { %v1389_v43 = vmul.f32 %v2163_v38, %v1241_v1  ;;  %v1390_v46 = vmul.f32 %v2165_v39, %v1287_v2 }
 0x42e   : > { %v2032_v27 = vpop.f32.mrf.mxu1  ;;  %v2038_v28 = vpop.f32.mrf.mxu0 }
 0x42f   : > { %v2167_v40 = vpop.eup %2166 }
 0x430   : > { %v1244_v29 = vpop.f32.mrf.mxu1  ;;  %v1290_v30 = vpop.f32.mrf.mxu0 }
 0x431   : > { %v2169_v42 = vpop.eup %2168 }
 0x432   : > { %v2033_v31 = vpop.f32.mrf.mxu1  ;;  %v2039_v32 = vpop.f32.mrf.mxu0 }
 0x458   : > { %v1333_v41 = vpop.f32.mrf.mxu1 }
 0x459   : > { %v1391_v44 = vmul.f32 %v2167_v40, %v1333_v41  ;;  %v1379_v45 = vpop.f32.mrf.mxu0 }
 0x45a   : > { %v1392_v47 = vmul.f32 %v2169_v42, %v1379_v45  ;;  %v2044_v48 = vpop.f32.mrf.mxu1 }
 0x45b   : > { %v1393_v49 = vcombine.low %v1389_v43, %v1391_v44  ;;  %v1394_v50 = vcombine.high %v1389_v43, %v1391_v44  ;;  %v2050_v51 = vpop.f32.mrf.mxu0 }
 0x45c   : > { %v1409_v52 = vcombine.low %v1390_v46, %v1392_v47  ;;  %v1410_v53 = vcombine.high %v1390_v46, %v1392_v47  ;;  %v1336_v54 = vpop.f32.mrf.mxu1  ;;  %v2149_v51 = vld [vmem:[#allocation2] sm:$0xff]  }
 0x45d   : > { %v1401_v55 = vrot.slane %v1393_v49, %v2459_v23  ;;  %v1408_v56 = vrot.slane %v1394_v50, %v2459_v23  ;;  %v1382_v57 = vpop.f32.mrf.mxu0  ;;  %v2148_v50 = vld [vmem:[#allocation2 + $0x8] sm:$0xff]  }
 0x45e   : > { %v1417_v58 = vrot.slane %v1409_v52, %v2459_v23  ;;  %v1424_v59 = vrot.slane %v1410_v53, %v2459_v23  ;;  %v2045_v60 = vpop.f32.mrf.mxu1  ;;  %2061 = vmatpush3.bf16.msra.mxu0 %v2148_v50  ;;  %v1949_v57 = vld [vmem:[%s2689_s10] ss:$0 sm:$0xff] }
 0x45f   : > { %v2051_v61 = vpop.f32.mrf.mxu0  ;;  %2062 = vmatprep.subr.bf16.mxu0 %v2271_v0 }
 0x460   : > { %v1425_v63 = vcombine.low %v1401_v55, %v1417_v58  ;;  %v1426_v4 = vcombine.high %v1401_v55, %v1417_v58  ;;  %v1441_v5 = vcombine.low %v1408_v56, %v1424_v59  ;;  %v1442_v6 = vcombine.high %v1408_v56, %v1424_v59  ;;  %v1948_v55 = vld [vmem:[%s2688_s9] ss:$0 sm:$0xff]  ;;  %v2150_v61 = vld [vmem:[%s2686_s7 + $0x18] sm:$0xff]  }
 0x462   : > { %v1433_v7 = vrot.slane %v1425_v63, %v2467_v33  ;;  %v1440_v8 = vrot.slane %v1426_v4, %v2467_v33  ;;  %v1449_v9 = vrot.slane %v1441_v5, %v2467_v33  ;;  %v1456_v10 = vrot.slane %v1442_v6, %v2467_v33  ;;  %2063 = vmatpush3.bf16.msra.mxu0 %v2149_v51  ;;  %v2152_v63 = vld [vmem:[%s2686_s7 + $0x8] sm:$0xff]   ;;  %v2153_v4 = vld [vmem:[%s2686_s7] sm:$0xff]  }
 0x463   : > { %v1950_v5 = vld [vmem:[%s2685_s6] ss:$0 sm:$0xff] }
 0x464   : > { %v1461_v14 = vcombine.low %v1433_v7, %v1440_v8  ;;  %v1942_v15 = vcombine.high %v1433_v7, %v1440_v8  ;;  %v1477_v16 = vcombine.low %v1449_v9, %v1456_v10  ;;  %v1943_v17 = vcombine.high %v1449_v9, %v1456_v10 }
 0x466   : > { %v1468_v18 = vrot.slane %v1461_v14, %v2459_v23  ;;  %v1476_v19 = vrot.slane %v1942_v15, %v2459_v23  ;;  %v1484_v20 = vrot.slane %v1477_v16, %v2459_v23  ;;  %v1492_v21 = vrot.slane %v1943_v17, %v2459_v23 }
 0x468   : > { %v1494_v13 = vcombine.high %v1468_v18, %v1476_v19  ;;  %v1510_v22 = vcombine.high %v1484_v20, %v1492_v21  ;;  %v1493_v12 = vcombine.low %v1468_v18, %v1476_v19  ;;  %v1509_v24 = vcombine.low %v1484_v20, %v1492_v21  ;;  %v1954_v18 = vld [vmem:[%s2687_s8] ss:$0 sm:$0xff] }
 0x46a   : > { %v1508_v25 = vrot.slane %v1494_v13, %v2467_v33  ;;  %v1524_v26 = vrot.slane %v1510_v22, %v2467_v33  ;;  %v1501_v1 = vrot.slane %v1493_v12, %v2467_v33  ;;  %v1517_v2 = vrot.slane %v1509_v24, %v2467_v33 }
 0x46c   : > { %v1527_v27 = vcombine.low %v1508_v25, %v1524_v26  ;;  %v1526_v28 = vcombine.high %v1501_v1, %v1517_v2  ;;  %v1525_v29 = vcombine.low %v1501_v1, %v1517_v2  ;;  %v1528_v23 = vcombine.high %v1508_v25, %v1524_v26 }
 0x46e   : > { %1534 = vrot.lane.b32.xlu1 %v1527_v27, %s2280_s5  ;;  %1530 = vrot.lane.b32.xlu0 %v1526_v28, %s2281_s22  ;;  %s1963_s5 = sshll.u32 %s2375_s29, 7  ;;  %s446_s22 = scalar_lea.vmem [#allocation5], %s1922_s30 }
 0x46f   : > { %s1843_s2 = scalar_lea.hbm %s2692_s13, %s1963_s5  ;;  %s2208_s29 = scalar_lea.vmem %s2207_s21, 256 }
 0x472   : > { %1538 = vrot.lane.b32.xlu1 %v1528_v23, %s2282_s23  ;;  %s1845_s23 = sshll.u32 %s446_s22, 4  ;;  %s1846_s23 = int_to_ptr.vmem [resolvable:$true] %s1845_s23 }
 0x473   : > { %s2202_s15 = scalar_lea.vmem %s1846_s23, 128  ;;  %p2209_p11 = scmp.lt.s32.totalorder %s1846_s23, %s2207_s21 }
 0x474   : > { %p2203_p6 = scmp.ne.s32.totalorder %s1846_s23, %s2202_s15  ;;  %p2210_p12 = scmp.lt.s32.totalorder %s2208_s29, %s2202_s15 }
 0x476   : > { %p2204_p9 = pnand %p2203_p6, %p2392_p5  ;;  %p2211_p13 = por %p2210_p12, %p2209_p11 }
 0x478   : > { %p2205_p10 = pneg %p2204_p9 }
 0x47a   : > { %p2212_p0 = pnand %p2211_p13, %p2205_p10 }
 0x4e0   : > { %v1535_v30 = vpop.permute.xlu1 %1534  ;;  %v1531_v31 = vpop.permute.xlu0 %1530 }
 0x4e1   : > { %v1541_v32 = vsel %vm975_vm2, %v1525_v29, %v1531_v31  ;;  %v1960_v31 = vld [vmem:[%s2690_s11] ss:$0 sm:$0xff] }
 0x4e2   : > { %v1543_v35 = vsel %vm1542_vm4, %v1541_v32, %v1535_v30 }
 0x4e4   : > { %v1539_v34 = vpop.permute.xlu1 %1538 }
 0x4e5   : > { %v1545_v36 = vsel %vm1544_vm5, %v1543_v35, %v1539_v34  ;;  %v1961_v34 = vld [vmem:[%s2691_s12] ss:$0 sm:$0xff] }
 0x4e6   : > { %v1546_v33 = vpack.c.bf16 %v1545_v36, %v1545_v36 }
 0x4e8   : > { %2057 = vmatmul.mubr.msk.bf16.vlgmr.msra.gmra.mxu1 %vm477_vm1, %v1546_v33 }
 0x4e9   : > { %2076 = vmatprep.mubr.msk.bf16.mxu1 %vm2272_vm0, %v2271_v0  ;;  %2069 = vmatpush3.bf16.msra.mxu1 %v2150_v61 }
 0x4ea   : > { %2070 = vmatprep.subr.bf16.mxu1 %v2271_v0 }
 0x4ed   : > { %2071 = vmatpush3.bf16.msra.mxu1 %v2151_v62 }
 0x4ee   : > { %2072 = vmatprep.subr.bf16.mxu1 %v2271_v0 }
 0x4f1   : > { %2073 = vmatpush3.bf16.msra.mxu1 %v2152_v63 }
 0x4f2   : > { %2074 = vmatprep.subr.bf16.mxu1 %v2271_v0 }
 0x4f5   : > { %2075 = vmatpush3.bf16.msra.mxu1 %v2153_v4 }
 0x5a8   : > { %v1607_v38 = vpop.f32.mrf.mxu1 }
 0x5a9   : > { %v1608_v39 = vadd.f32 %v1944_v37, %v1607_v38 }
 0x5aa   : > { %v2058_v40 = vpop.f32.mrf.mxu1 }
 0x5ab   : > { %v1613_v41 = vadd.f32 %v1608_v39, %v2437_v3 }
 0x5ac   : > { %v1610_v42 = vpop.f32.mrf.mxu1 }
 0x5ad   : > { %v1616_v43 = vsel %vm477_vm1, %v1613_v41, 0.0 }
 0x5ae   : > { %1617 = vadd.xlane.f32.xlu0 %v1616_v43  ;;  %v2059_v44 = vpop.f32.mrf.mxu1 }
 0x637   : > { %v1618_v45 = vpop.xlane.xlu0 %1617 }
 0x638   : > { %v1620_v46 = vmul.f32 0.03125, %v1618_v45 }
 0x63a   : > { %v1621_v47 = vsub.f32 %v1613_v41, %v1620_v46 }
 0x63c   : > { %v1622_v48 = vmul.f32 %v1621_v47, %v1621_v47 }
 0x63e   : > { %v1623_v49 = vsel %vm477_vm1, %v1622_v48, 0.0 }
 0x63f   : > { %1624 = vadd.xlane.f32.xlu1 %v1623_v49 }
 0x6c8   : > { %v1625_v52 = vpop.xlane.xlu1 %1624 }
 0x6c9   : > { %v1626_v3 = vmul.f32 0.03125, %v1625_v52 }
 0x6cb   : > { %v1627_v53 = vadd.f32 1e-12, %v1626_v3 }
 0x6cd   : > { %2170 = vrsqrt.f32 %v1627_v53 }
 0x6da   : > { %v2171_v54 = vpop.eup %2170 }
 0x6db   : > { %v1629_v56 = vmul.f32 %v2171_v54, %v1621_v47 }
 0x6dd   : > { %v1636_v58 = vmul.f32 %v1948_v55, %v1629_v56 }
 0x6df   : > { %v1643_v59 = vadd.f32 %v1949_v57, %v1636_v58 }
 0x6e1   : > { %v1644_v60 = vpack.c.bf16 %v1643_v59, %v1643_v59 }
 0x6e3   : > { %2065 = vmatmul.mubr.msk.bf16.vlgmr.msra.gmra.mxu0 %vm477_vm1, %v1644_v60 }
 0x7a3   : > { %v1705_v6 = vpop.f32.mrf.mxu0 }
 0x7a4   : > { %v1706_v7 = vadd.f32 %v1950_v5, %v1705_v6 }
 0x7a5   : > { %v2066_v8 = vpop.f32.mrf.mxu0 }
 0x7a6   : > { %v1712_v9 = vmul.f32 0.70710677, %v1706_v7  ;;  %v1711_v15 = vmul.f32 0.5, %v1706_v7 }
 0x7a7   : > { %v1708_v10 = vpop.f32.mrf.mxu0 }
 0x7a8   : > { %2172 = verf.f32 %v1712_v9 }
 0x7a9   : > { %v2067_v11 = vpop.f32.mrf.mxu0 }
 0x7b5   : > { %v2173_v14 = vpop.eup %2172 }
 0x7b6   : > { %v1714_v16 = vadd.f32 1.0, %v2173_v14 }
 0x7b8   : > { %v1715_v0 = vmul.f32 %v1714_v16, %v1711_v15 }
 0x7ba   : > { %v1716_v17 = vpack.c.bf16 %v1715_v0, %v1715_v0 }
 0x7bc   : > { %2077 = vmatmul.mubr.msk.bf16.vlgmr.msra.gmra.mxu1 %vm1756_vm6, %v1716_v17 }
 0x87c   : > { %v1794_v19 = vpop.f32.mrf.mxu1 }
 0x87d   : > { %v1795_v20 = vadd.f32 %v1954_v18, %v1794_v19 }
 0x87e   : > { %v2078_v21 = vpop.f32.mrf.mxu1 }
 0x87f   : > { %v1800_v13 = vadd.f32 %v1795_v20, %v1643_v59 }
 0x880   : > { %v1797_v22 = vpop.f32.mrf.mxu1 }
 0x881   : > { %v1803_v12 = vsel %vm477_vm1, %v1800_v13, 0.0 }
 0x882   : > { %1804 = vadd.xlane.f32.xlu0 %v1803_v12  ;;  %v2079_v24 = vpop.f32.mrf.mxu1 }
 0x90b   : > { %v1805_v25 = vpop.xlane.xlu0 %1804 }
 0x90c   : > { %v1806_v26 = vmul.f32 0.03125, %v1805_v25 }
 0x90e   : > { %v1807_v1 = vsub.f32 %v1800_v13, %v1806_v26 }
 0x910   : > { %v1808_v2 = vmul.f32 %v1807_v1, %v1807_v1 }
 0x912   : > { %v1809_v27 = vsel %vm477_vm1, %v1808_v2, 0.0 }
 0x913   : > { %1810 = vadd.xlane.f32.xlu0 %v1809_v27 }
 0x99c   : > { %v1811_v28 = vpop.xlane.xlu0 %1810 }
 0x99d   : > { %v1812_v29 = vmul.f32 0.03125, %v1811_v28 }
 0x99f   : > { %v1813_v23 = vadd.f32 1e-12, %v1812_v29 }
 0x9a1   : > { %2174 = vrsqrt.f32 %v1813_v23 }
 0x9ae   : > { %v2175_v30 = vpop.eup %2174 }
 0x9af   : > { %v1815_v32 = vmul.f32 %v2175_v30, %v1807_v1 }
 0x9b1   : > { %v1822_v35 = vmul.f32 %v1960_v31, %v1815_v32 }
 0x9b3   : > { %v1829_v36 = vadd.f32 %v1961_v34, %v1822_v35 }
 0x9b5   : > { %1830 = vst.msk [vmem:[%s446_s22] sm:$0xff] %vm477_vm1, %v1829_v36 }
 0x9b6   : > { %2215 = shalt.err (!%p2212_p0)
}
 0x9b7   : > { %s2216_s0 = scalar_lea.hbm %s1843_s2, 128  ;;  %s2220_s30 = scalar_lea.hbm %s2692_s13, 256 }
 0x9b8   : > { %p2217_p1 = scmp.ne.s32.totalorder %s1843_s2, %s2216_s0  ;;  %p2221_p4 = scmp.lt.s32.totalorder %s1843_s2, %s2692_s13 }
 0x9b9   : > { %p2222_p7 = scmp.lt.s32.totalorder %s2220_s30, %s2216_s0 }
 0x9ba   : > { %p2218_p2 = pnand %p2217_p1, %p2392_p5 }
 0x9bb   : > { %p2223_p8 = por %p2222_p7, %p2221_p4 }
 0x9bc   : > { %p2219_p3 = pneg %p2218_p2 }
 0x9be   : > { %p2224_p6 = pnand %p2223_p8, %p2219_p3 }
 0x9c0   : > { %2227 = shalt.err (!%p2224_p6)
}
 0x9c1   : > { %2084 = dma.vmem_to_hbm [thread:$0]  (%p2392_p5), %s1846_s23, 128, %s1843_s2, %s1832_s3  }
 0x9c2 PF: > { %p2096_p9 = scmp.ge.s32.totalorder %s2266_s28, 2  ;;  %s1857_s22 = sand.u32 1, %s2254_s25  }
 0x9c3   : > { %p2706_p10 = scmp.ne.s32.totalorder %s2699_s19, 0  ;;  %s1858_s15 = scalar_lea.sflag [#allocation4], %s1857_s22 }
 0x9c5   : > { %p2091_p11 = pnand %p2096_p9, %p2706_p10 }
 0x9c7   : > { %p2092_p12 = pneg %p2091_p11 }
 0x9c9   : > { %2249 = dma.done.wait (%p2092_p12), %s1858_s15, 128  }
 0x9ca   : > { %2251 = vsyncadd (%p2092_p12), %s1858_s15, 4294967168  ;;  %p24_p13 = scmp.ge.s32.totalorder %s2379_s14, 4   ;;  %s2707_s25 = smov %s2258_s26 }
 0x9cb   : > { %s2708_s26 = smov %s2262_s27  ;;  %s2709_s27 = smov %s2390_s17 }
 0x9cc   : > { %s2710_s28 = smov %s2379_s14  ;;  %26 = sbr.rel (!%p24_p13) target bundleno = 10 (0xa), region = 112 }
 0x9d1   :  { %1863 = vsyncpa [#allocation3], 1 }
 0x9d2   :  { %1865 = vsyncpa [#allocation3 + $0x1], 1 }
 0x9d3   :  { %1866 = vsyncpa [#allocation4], 1 }
 0x9d4   :  { %1868 = vsyncpa [#allocation4 + $0x1], 1 }

</bundles_post_ra>
